<compile_context>
chip_gen: v7x
topology: tpu7x:2x2x1
jax: 0.10.0
libtpu: 0.0.40
codegen_flags: <defaults>
</compile_context>

<pallas_src>
import math
from functools import lru_cache, partial

import jax
import jax.numpy as jnp
from jax.experimental import pallas as pl
from jax.experimental.pallas import tpu as pltpu


# ----------------------------------------------------------------------------
# Utilities
# ----------------------------------------------------------------------------
def _pick_tile(dim, target, align):
    """Largest tile <= target that is a multiple of `align` and divides `dim`
    evenly; falls back to the full dim (a full-extent block is always legal)."""
    if dim <= target:
        return dim
    t = (target // align) * align
    while t >= align:
        if dim % t == 0:
            return t
        t -= align
    return dim


_VMEM_CAP = None


def _vmem_capacity_bytes():
    """Physical VMEM of this chip; conservative 64 MiB (v7x-sized) fallback."""
    global _VMEM_CAP
    if _VMEM_CAP is None:
        try:
            _VMEM_CAP = int(pltpu.get_tpu_info().vmem_capacity_bytes)
        except Exception:
            _VMEM_CAP = 64 * 1024 * 1024
    return _VMEM_CAP


def _big_vmem():
    # v5e/v6e: 128 MiB per core; v7x: 64 MiB per core.
    return _vmem_capacity_bytes() >= 96 * 1024 * 1024


@lru_cache(maxsize=None)
def _head_major_relayout_ok(m, h, d, dtype_name):
    """Probe whether pltpu.einshape('mhd->hmd') compiles AND is bit-correct for
    this (m, h, d, dtype).  If not, the attention kernel falls back to per-head
    ref slicing (known-good)."""
    einshape = getattr(pltpu, "einshape", None)
    if einshape is None:
        return False
    dtype = jnp.dtype(dtype_name)

    def _probe(x_ref, o_ref):
        o_ref[...] = einshape("mhd->hmd", x_ref[...])

    try:
        x = (jax.lax.iota(jnp.int32, m * h * d) % 251).reshape(m, h, d).astype(dtype)
        out = pl.pallas_call(
            _probe, out_shape=jax.ShapeDtypeStruct((h, m, d), dtype))(x)
        jax.block_until_ready(out)
        return bool(jnp.array_equal(out, jnp.transpose(x, (1, 0, 2))))
    except Exception:
        return False


# ----------------------------------------------------------------------------
# Kernel 1: tiled affine projection  y = x @ W + b   (W stored as (d_in, d_out))
# ----------------------------------------------------------------------------
def _linear_kernel(x_ref, w_ref, b_ref, o_ref, acc_ref):
    k = pl.program_id(2)

    @pl.when(k == 0)
    def _init():
        acc_ref[...] = jnp.zeros_like(acc_ref)

    acc_ref[...] += jnp.dot(x_ref[...], w_ref[...],
                            preferred_element_type=jnp.float32)

    @pl.when(k == pl.num_programs(2) - 1)
    def _store():
        o_ref[...] = (acc_ref[...] + b_ref[...]).astype(o_ref.dtype)


def linear(x2d, w, b, *, out_dtype=jnp.float32,
           tile_m=None, tile_n=None, tile_k=None):
    """x2d: (N, d_in), w: (d_in, d_out), b: (1, d_out) -> (N, d_out)."""
    N, d_in = x2d.shape
    d_out = w.shape[1]
    if w.dtype != x2d.dtype:          # no-op when params were prepared up front
        w = w.astype(x2d.dtype)
    if b.dtype != jnp.float32:
        b = b.astype(jnp.float32)

    big = _big_vmem()
    # Bigger tiles on 128 MiB parts (less A/W re-streaming, fewer grid steps);
    # keep the conservative 512/32 MiB settings on 64 MiB v7x.
    tm = _pick_tile(N, tile_m or 512, 8)
    tn = _pick_tile(d_out, tile_n or (1024 if big else 512), 128)
    tk = _pick_tile(d_in, tile_k or (1024 if big else 512), 128)
    grid = (N // tm, d_out // tn, d_in // tk)

    in_bytes = jnp.dtype(x2d.dtype).itemsize
    out_bytes = jnp.dtype(out_dtype).itemsize
    cost = pl.CostEstimate(
        flops=2 * N * d_in * d_out,
        transcendentals=0,
        bytes_accessed=(N * d_in * (d_out // tn) + d_in * d_out * (N // tm)) * in_bytes
        + (N * d_out + d_out) * out_bytes,
    )

    return pl.pallas_call(
        _linear_kernel,
        out_shape=jax.ShapeDtypeStruct((N, d_out), out_dtype),
        grid=grid,
        in_specs=[
            pl.BlockSpec((tm, tk), lambda i, j, k: (i, k)),
            pl.BlockSpec((tk, tn), lambda i, j, k: (k, j)),
            pl.BlockSpec((1, tn), lambda i, j, k: (0, j)),
        ],
        out_specs=pl.BlockSpec((tm, tn), lambda i, j, k: (i, j)),
        scratch_shapes=[pltpu.VMEM((tm, tn), jnp.float32)],
        compiler_params=pltpu.CompilerParams(
            dimension_semantics=("parallel", "parallel", "arbitrary"),
            vmem_limit_bytes=(64 if big else 32) * 1024 * 1024,
        ),
        cost_estimate=cost,
    )(x2d, w, b)


# ----------------------------------------------------------------------------
# Kernel 2: flash-style scaled dot-product attention.
#   Grid (B, q-tiles, kv-tiles); kv is the streamed reduction axis; all heads of
#   one (batch, q-tile) are processed per step with online softmax state in VMEM.
# ----------------------------------------------------------------------------
def _attention_kernel(q_ref, k_ref, v_ref, o_ref, q_hm, m_sc, l_sc, acc_sc,
                      *, use_einshape):
    """q_ref: (tq, h, d_k); k_ref/v_ref: (tkv, h, d_k); o_ref: (tq, h*d_k)."""
    h, tq, d_k = acc_sc.shape
    kv = pl.program_id(2)
    scale = 1.0 / math.sqrt(d_k)
    in_dtype = q_ref.dtype

    @pl.when(kv == 0)
    def _init():
        # Scaled, head-major Q is built once per (batch, q-tile) and stays in
        # VMEM scratch across all kv steps (1/sqrt(d_k) folded in: O(tq*d_k)).
        if use_einshape:
            qh = pltpu.einshape("mhd->hmd", q_ref[...])            # (h, tq, d_k)
            q_hm[...] = (qh.astype(jnp.float32) * scale).astype(q_hm.dtype)
        else:
            for head in range(h):
                q_hm[head] = (q_ref[:, head, :].astype(jnp.float32)
                              * scale).astype(q_hm.dtype)
        m_sc[...] = jnp.full_like(m_sc, -jnp.inf)
        l_sc[...] = jnp.zeros_like(l_sc)
        acc_sc[...] = jnp.zeros_like(acc_sc)

    if use_einshape:
        # One head-major relayout per K/V block; heads then index the leading
        # (slab) dim, which is free — no per-head sublane-strided gathers.
        k_heads = pltpu.einshape("mhd->hmd", k_ref[...])           # (h, tkv, d_k)
        v_heads = pltpu.einshape("mhd->hmd", v_ref[...])

    # Static unroll over heads (h is small).  Every head's temporaries are
    # consumed into the scratch refs within the iteration, so the live working
    # set stays at the (tq, tkv) tile — no full-S scores ever exist.
    for head in range(h):
        q = q_hm[head]                                             # (tq, d_k)
        k = k_heads[head] if use_einshape else k_ref[:, head, :]   # (tkv, d_k)
        v = v_heads[head] if use_einshape else v_ref[:, head, :]
        # Contract the last dims of both operands: no explicit k.T transpose.
        s = jax.lax.dot_general(q, k, (((1,), (1,)), ((), ())),
                                preferred_element_type=jnp.float32)   # (tq, tkv)
        m_prev = m_sc[head]                                        # (tq, 1)
        m_new = jnp.maximum(m_prev, jnp.max(s, axis=-1, keepdims=True))
        alpha = jnp.exp(m_prev - m_new)
        p = jnp.exp(s - m_new)                                     # f32 softmax
        l_sc[head] = alpha * l_sc[head] + jnp.sum(p, axis=-1, keepdims=True)
        acc_sc[head] = alpha * acc_sc[head] + jnp.dot(
            p.astype(in_dtype), v, preferred_element_type=jnp.float32)
        m_sc[head] = m_new

    @pl.when(kv == pl.num_programs(2) - 1)
    def _store():
        for head in range(h):
            ctx = acc_sc[head] * pl.reciprocal(l_sc[head], approx=True)
            # Lane-dense (tq, h*d_k) output block: head lands at lane offset
            # head*d_k, so the HBM writeback is a full-width unmasked store and
            # "concat heads" needs no further data movement.
            o_ref[:, head * d_k:(head + 1) * d_k] = ctx.astype(o_ref.dtype)


def _attn_tiles(Sq, Skv, h, d_k, in_itemsize, out_itemsize, budget):
    """Pick (tq, tkv) so q + K + V + out blocks + scratch + live scores fit."""
    hd = h * d_k
    # K and V streaming blocks, double-buffered each: 4 * tkv * hd * itemsize.
    tkv_cap = max(128, (budget // 3) // max(1, 4 * hd * in_itemsize))
    tkv = _pick_tile(Skv, min(512, (tkv_cap // 128) * 128), 128)
    # Per q-row resident bytes: q block (2 buf) + q_hm scratch + f32 acc
    # + out block (2 buf) + one live f32 score row.
    per_row = (3 * hd * in_itemsize + hd * 4 + 2 * hd * out_itemsize
               + tkv * 4 + 64)
    tq_cap = max(8, (budget - 4 * tkv * hd * in_itemsize) // max(1, per_row))
    tq = _pick_tile(Sq, min(512, (tq_cap // 8) * 8), 8)
    return tq, tkv


def scaled_dot_product_attention(q_arr, k_arr, v_arr, sel=(0, 0, 0), *,
                                 out_dtype=None):
    """q/k/v arrays have shape (B, S, P, h, d_k) with P in {1, 3}; `sel` picks
    which packed projection slot each operand reads, so the fused QKV output can
    be passed three times without any host-side slicing/copies.  Returns the
    attention output already in concat-heads layout (B, Sq, h*d_k)."""
    B, Sq, _, h, d_k = q_arr.shape
    Skv = k_arr.shape[1]
    if out_dtype is None:
        out_dtype = q_arr.dtype
    hd = h * d_k

    big = _big_vmem()
    vmem_limit = (64 if big else 32) * 1024 * 1024
    in_sz = jnp.dtype(q_arr.dtype).itemsize
    out_sz = jnp.dtype(out_dtype).itemsize
    tq, tkv = _attn_tiles(Sq, Skv, h, d_k, in_sz, out_sz, vmem_limit // 2)
    grid = (B, Sq // tq, Skv // tkv)

    dname = jnp.dtype(q_arr.dtype).name
    use_einshape = (_head_major_relayout_ok(tq, h, d_k, dname)
                    and _head_major_relayout_ok(tkv, h, d_k, dname))

    n_q = Sq // tq
    cost = pl.CostEstimate(
        flops=4 * B * h * Sq * Skv * d_k,
        transcendentals=B * h * Sq * Skv,
        bytes_accessed=(B * Sq * hd + 2 * B * Skv * hd * n_q) * in_sz
        + B * Sq * hd * out_sz,
    )

    sq, sk, sv = sel
    kernel = partial(_attention_kernel, use_einshape=use_einshape)
    return pl.pallas_call(
        kernel,
        out_shape=jax.ShapeDtypeStruct((B, Sq, hd), out_dtype),
        grid=grid,
        in_specs=[
            pl.BlockSpec((None, tq, None, h, d_k),
                         lambda b, qi, kv, s=sq: (b, qi, s, 0, 0)),
            pl.BlockSpec((None, tkv, None, h, d_k),
                         lambda b, qi, kv, s=sk: (b, kv, s, 0, 0)),
            pl.BlockSpec((None, tkv, None, h, d_k),
                         lambda b, qi, kv, s=sv: (b, kv, s, 0, 0)),
        ],
        out_specs=pl.BlockSpec((None, tq, hd), lambda b, qi, kv: (b, qi, 0)),
        scratch_shapes=[
            pltpu.VMEM((h, tq, d_k), q_arr.dtype),   # scaled head-major Q
            pltpu.VMEM((h, tq, 1), jnp.float32),     # running max m
            pltpu.VMEM((h, tq, 1), jnp.float32),     # running denom l
            pltpu.VMEM((h, tq, d_k), jnp.float32),   # f32 context accumulator
        ],
        compiler_params=pltpu.CompilerParams(
            # Batch first: a v7x megacore split over b keeps each core's K/V unique.
            dimension_semantics=("parallel", "parallel", "arbitrary"),
            vmem_limit_bytes=vmem_limit,
        ),
        cost_estimate=cost,
    )(q_arr, k_arr, v_arr)


# ----------------------------------------------------------------------------
# Parameter preparation (hoisted out of the forward) + forward pass glue
# ----------------------------------------------------------------------------
def prepare_params(params, *, compute_dtype=jnp.float32):
    """Materialize the fused [Wq|Wk|Wv] concat, fused bias and compute-dtype
    casts once at setup time (not per forward call)."""
    cd = jnp.dtype(compute_dtype)
    p = {"h": int(params["h"]), "compute_dtype": cd}
    p["w_qkv"] = jnp.concatenate(
        [params["wq"], params["wk"], params["wv"]], axis=1).astype(cd)
    p["b_qkv"] = jnp.concatenate(
        [params["bq"], params["bk"], params["bv"]], axis=1).astype(jnp.float32)
    for nm in ("q", "k", "v", "o"):
        p["w" + nm] = params["w" + nm].astype(cd)
        p["b" + nm] = params["b" + nm].astype(jnp.float32)
    return p


def multi_headed_attention(params, query, key, value, *, compute_dtype=None):
    """Forward pass (mask=None, dropout in eval mode).  bf16 compute is supported
    on all TPU generations (accumulation/softmax stay f32 in-kernel)."""
    if "w_qkv" not in params:   # accept raw params; prefer prepare_params() once
        params = prepare_params(params,
                                compute_dtype=compute_dtype or jnp.float32)
    cd = params["compute_dtype"]
    B, S, d_model = query.shape
    h = int(params["h"])
    assert d_model % h == 0
    d_k = d_model // h

    if (query is key) and (key is value):
        # Self-attention: one x @ [Wq|Wk|Wv] matmul, x read from HBM once.
        x2d = query.reshape(B * S, d_model).astype(cd)
        qkv = linear(x2d, params["w_qkv"], params["b_qkv"], out_dtype=cd)
        qkv = qkv.reshape(B, S, 3, h, d_k)      # free reshape (trailing split)
        attn = scaled_dot_product_attention(qkv, qkv, qkv, sel=(0, 1, 2))
    else:
        def project(x, w, b):
            Sx = x.shape[1]
            y = linear(x.reshape(B * Sx, d_model).astype(cd), w, b, out_dtype=cd)
            return y.reshape(B, Sx, 1, h, d_k)  # free reshape

        q = project(query, params["wq"], params["bq"])
        k = project(key, params["wk"], params["bk"])
        v = project(value, params["wv"], params["bv"])
        attn = scaled_dot_product_attention(q, k, v, sel=(0, 0, 0))

    # attn is already (B, S, d_model) lane-dense; feed W_o directly.
    out = linear(attn.reshape(B * S, d_model), params["wo"], params["bo"],
                 out_dtype=jnp.float32)
    return out.reshape(B, S, d_model)


# ----------------------------------------------------------------------------
# Pure-JAX reference (for sanity check)
# ----------------------------------------------------------------------------
def reference(params, query, key, value):
    B, S, d_model = query.shape
    h = int(params["h"])
    d_k = d_model // h

    def proj(x, w, b):
        y = x @ w + b[0]
        return y.reshape(B, S, h, d_k).transpose(0, 2, 1, 3)

    q = proj(query, params["wq"], params["bq"])
    k = proj(key, params["wk"], params["bk"])
    v = proj(value, params["wv"], params["bv"])
    scores = jnp.einsum("bhqd,bhkd->bhqk", q, k) / math.sqrt(d_k)
    p = jax.nn.softmax(scores, axis=-1)
    x = jnp.einsum("bhqk,bhkd->bhqd", p, v)
    x = x.transpose(0, 2, 1, 3).reshape(B, S, d_model)
    return x @ params["wo"] + params["bo"][0]


def _init_params(rng, d_model, h):
    keys = jax.random.split(rng, 8)
    bound = 1.0 / math.sqrt(d_model)

    def init_linear(kw, kb):
        w = jax.random.uniform(kw, (d_model, d_model), jnp.float32, -bound, bound)
        b = jax.random.uniform(kb, (1, d_model), jnp.float32, -bound, bound)
        return w, b

    wq, bq = init_linear(keys[0], keys[1])
    wk, bk = init_linear(keys[2], keys[3])
    wv, bv = init_linear(keys[4], keys[5])
    wo, bo = init_linear(keys[6], keys[7])
    return dict(h=h, wq=wq, bq=bq, wk=wk, bk=bk, wv=wv, bv=bv, wo=wo, bo=bo)


# ----------------------------------------------------------------------------
if __name__ == "__main__":
    root = jax.random.PRNGKey(0)
    (k_par, k_x, k_q, k_k, k_v,
     k_par2, k_x2, k_par3, k_x3) = jax.random.split(root, 9)

    # --- small shape: self-attention (fused QKV path) and cross-attention path ---
    B, S, d_model, h = 2, 8, 32, 4
    params = _init_params(k_par, d_model, h)
    prepared = prepare_params(params)

    x_self = jax.random.normal(k_x, (B, S, d_model), jnp.float32)
    out_self = jax.block_until_ready(
        multi_headed_attention(prepared, x_self, x_self, x_self))
    ref_self = reference(params, x_self, x_self, x_self)
    assert out_self.shape == (B, S, d_model)
    # approx (EUP) reciprocal in the softmax denominator -> slightly looser than 1e-4
    assert jnp.allclose(out_self, ref_self, atol=5e-3, rtol=5e-3), "self-attn mismatch"

    q_in = jax.random.normal(k_q, (B, S, d_model), jnp.float32)
    k_in = jax.random.normal(k_k, (B, S, d_model), jnp.float32)
    v_in = jax.random.normal(k_v, (B, S, d_model), jnp.float32)
    out_cross = jax.block_until_ready(
        multi_headed_attention(prepared, q_in, k_in, v_in))
    ref_cross = reference(params, q_in, k_in, v_in)
    assert jnp.allclose(out_cross, ref_cross, atol=5e-3, rtol=5e-3), "cross-attn mismatch"

    # --- medium shape: multi-tile projection grids + k-axis accumulation ---
    B2, S2, d_model2, h2 = 2, 128, 1024, 8
    params2 = _init_params(k_par2, d_model2, h2)
    prepared2 = prepare_params(params2)
    x2 = jax.random.normal(k_x2, (B2, S2, d_model2), jnp.float32)
    out2 = jax.block_until_ready(multi_headed_attention(prepared2, x2, x2, x2))
    ref2 = reference(params2, x2, x2, x2)
    assert out2.shape == (B2, S2, d_model2)
    assert jnp.allclose(out2, ref2, atol=2e-2, rtol=2e-2), "medium-shape mismatch"

    # --- long shape: exercises the flash KV-streaming path (multiple kv tiles),
    #     multiple q tiles, and d_k=64 lane-offset output stores ---
    B3, S3, d_model3, h3 = 1, 1024, 256, 4
    params3 = _init_params(k_par3, d_model3, h3)
    prepared3 = prepare_params(params3)
    x3 = jax.random.normal(k_x3, (B3, S3, d_model3), jnp.float32)
    out3 = jax.block_until_ready(multi_headed_attention(prepared3, x3, x3, x3))
    ref3 = reference(params3, x3, x3, x3)
    assert out3.shape == (B3, S3, d_model3)
    assert jnp.allclose(out3, ref3, atol=2e-2, rtol=2e-2), "long-seq mismatch"

    # --- bf16 compute path (enabled on all generations; f32 acc/softmax in-kernel) ---
    prepared2_bf16 = prepare_params(params2, compute_dtype=jnp.bfloat16)
    out2_bf16 = jax.block_until_ready(
        multi_headed_attention(prepared2_bf16, x2, x2, x2))
    rel = float(jnp.linalg.norm(out2_bf16 - ref2) / jnp.linalg.norm(ref2))
    assert out2_bf16.dtype == jnp.float32 and rel < 0.1, f"bf16 path rel err {rel}"

    print("KERNEL_OK")
</pallas_src>

<mosaic_0001>
module attributes {stable_mosaic.version = 11 : i64} {
  func.func @_linear_kernel(%arg0: i32, %arg1: i32, %arg2: i32, %arg3: memref<16x32xf32, #tpu.memory_space<vmem>>, %arg4: memref<32x96xf32, #tpu.memory_space<vmem>>, %arg5: memref<1x96xf32, #tpu.memory_space<vmem>>, %arg6: memref<16x96xf32, #tpu.memory_space<vmem>>, %arg7: memref<16x96xf32, #tpu.memory_space<vmem>>) attributes {dimension_semantics = [#tpu.dimension_semantics<parallel>, #tpu.dimension_semantics<parallel>, #tpu.dimension_semantics<arbitrary>], iteration_bounds = array<i64: 1, 1, 1>, scalar_prefetch = 0 : i64, scratch_operands = 1 : i64, tpu.core_type = #tpu.core_type<tc>, window_params = [{transform_indices = @transform_0, window_bounds = array<i64: 16, 32>}, {transform_indices = @transform_1, window_bounds = array<i64: 32, 96>}, {transform_indices = @transform_2, window_bounds = array<i64: 1, 96>}, {transform_indices = @transform_3, window_bounds = array<i64: 16, 96>}]} {
    %c0_i32 = arith.constant 0 : i32
    %0 = arith.cmpi eq, %arg2, %c0_i32 : i32
    %1 = arith.extui %0 : i1 to i32
    %c0_i32_0 = arith.constant 0 : i32
    %2 = arith.cmpi ne, %1, %c0_i32_0 : i32
    scf.if %2 {
      %cst_10 = arith.constant 0.000000e+00 : f32
      %12 = vector.broadcast %cst_10 : f32 to vector<16x96xf32>
      %c0_11 = arith.constant 0 : index
      %c0_12 = arith.constant 0 : index
      %13 = vector.load %arg7[%c0_11, %c0_12] : memref<16x96xf32, #tpu.memory_space<vmem>>, vector<16x96xf32>
      tpu.vector_store %arg7[%c0_11, %c0_12], %12 {strides = array<i32>} : memref<16x96xf32, #tpu.memory_space<vmem>>, vector<16x96xf32>,
    } else {
    }
    %c0 = arith.constant 0 : index
    %c0_1 = arith.constant 0 : index
    %3 = vector.load %arg7[%c0, %c0_1] : memref<16x96xf32, #tpu.memory_space<vmem>>, vector<16x96xf32>
    %c0_2 = arith.constant 0 : index
    %c0_3 = arith.constant 0 : index
    %4 = vector.load %arg3[%c0_2, %c0_3] : memref<16x32xf32, #tpu.memory_space<vmem>>, vector<16x32xf32>
    %c0_4 = arith.constant 0 : index
    %c0_5 = arith.constant 0 : index
    %5 = vector.load %arg4[%c0_4, %c0_5] : memref<32x96xf32, #tpu.memory_space<vmem>>, vector<32x96xf32>
    %cst = arith.constant dense<0.000000e+00> : vector<16x96xf32>
    %6 = tpu.matmul %4, %5, %cst {dimension_numbers = #tpu.dot_dimension_numbers<[1], [0], [0], [1], [0, 0, 1, 1], [], []>} : vector<16x32xf32>, vector<32x96xf32>, vector<16x96xf32> -> vector<16x96xf32>
    %7 = arith.addf %3, %6 : vector<16x96xf32>
    %c0_6 = arith.constant 0 : index
    %c0_7 = arith.constant 0 : index
    %8 = vector.load %arg7[%c0_6, %c0_7] : memref<16x96xf32, #tpu.memory_space<vmem>>, vector<16x96xf32>
    tpu.vector_store %arg7[%c0_6, %c0_7], %7 {strides = array<i32>} : memref<16x96xf32, #tpu.memory_space<vmem>>, vector<16x96xf32>,
    %c0_i32_8 = arith.constant 0 : i32
    %9 = arith.cmpi eq, %arg2, %c0_i32_8 : i32
    %10 = arith.extui %9 : i1 to i32
    %c0_i32_9 = arith.constant 0 : i32
    %11 = arith.cmpi ne, %10, %c0_i32_9 : i32
    scf.if %11 {
      %c0_10 = arith.constant 0 : index
      %c0_11 = arith.constant 0 : index
      %12 = vector.load %arg7[%c0_10, %c0_11] : memref<16x96xf32, #tpu.memory_space<vmem>>, vector<16x96xf32>
      %c0_12 = arith.constant 0 : index
      %c0_13 = arith.constant 0 : index
      %13 = vector.load %arg5[%c0_12, %c0_13] : memref<1x96xf32, #tpu.memory_space<vmem>>, vector<1x96xf32>
      %14 = vector.broadcast %13 : vector<1x96xf32> to vector<16x96xf32>
      %15 = arith.addf %12, %14 : vector<16x96xf32>
      %c0_14 = arith.constant 0 : index
      %c0_15 = arith.constant 0 : index
      %16 = vector.load %arg6[%c0_14, %c0_15] : memref<16x96xf32, #tpu.memory_space<vmem>>, vector<16x96xf32>
      tpu.vector_store %arg6[%c0_14, %c0_15], %15 {strides = array<i32>} : memref<16x96xf32, #tpu.memory_space<vmem>>, vector<16x96xf32>,
    } else {
    }
    return
  }
  func.func @transform_0(%arg0: i32, %arg1: i32, %arg2: i32) -> (i32, i32) {
    %c0_i32 = arith.constant 0 : i32
    return %arg0, %arg2 : i32, i32
  }
  func.func @transform_1(%arg0: i32, %arg1: i32, %arg2: i32) -> (i32, i32) {
    %c0_i32 = arith.constant 0 : i32
    return %arg2, %arg1 : i32, i32
  }
  func.func @transform_2(%arg0: i32, %arg1: i32, %arg2: i32) -> (i32, i32) {
    %c0_i32 = arith.constant 0 : i32
    %c0_i32_0 = arith.constant 0 : i32
    return %c0_i32, %arg1 : i32, i32
  }
  func.func @transform_3(%arg0: i32, %arg1: i32, %arg2: i32) -> (i32, i32) {
    %c0_i32 = arith.constant 0 : i32
    return %arg0, %arg1 : i32, i32
  }
}

</mosaic_0001>

<bundles_post_ra>
// kernel: tpu_custom_call.1
= control target key start
LH: loop header
LB: loop body
LE: loop exit
PB: predicated region body
PF: predicated region fallthrough
CT: control target
= control target key end

     0   :  { %8 = vsyncpa [#allocation4], 0  ;;  %s365_s0 = inlined_call_operand.hbm [shape: f32[16,32], index: 0, kind: input, shape index: {}]   ;;  %s366_s1 = inlined_call_operand.hbm [shape: f32[32,96], index: 1, kind: input, shape index: {}]   ;;  %s367_s2 = inlined_call_operand.vmem [shape: f32[1,96], index: 2, kind: input, shape index: {}]   ;;  %s368_s3 = inlined_call_operand.hbm [shape: f32[16,96], index: 3, kind: output, shape index: {}]  }
   0x1   :  { %9 = vsyncpa [#allocation7], 0 }
   0x2   :  { %10 = vsyncpa [#allocation5], 0  ;;  %s285_s12 = smov [#allocation3]   ;;  %s213_s16 = scalar_lea.hbm %s365_s0, 256 }
   0x3   :  { %s16_s13 = sshll.u32 %s285_s12, 4  ;;  %p214_p0 = scmp.ne.s32.totalorder %s365_s0, %s213_s16  ;;  %s17_s13 = int_to_ptr.vmem [resolvable:$true] %s16_s13 }
   0x4   :  { %p217_p1 = scmp.lt.u32.totalorder %s213_s16, %s365_s0 }
   0x6   :  { %p219_p2 = pnand %p217_p1, %p214_p0 }
   0x8   :  { %222 = shalt.err (!%p219_p2)
}
   0x9   :  { %s223_s21 = scalar_lea.vmem %s17_s13, 256  ;;  %p228_p4 = scmp.lt.s32.totalorder %s17_s13, %s17_s13 }
   0xa   :  { %p224_p3 = scmp.ne.s32.totalorder %s17_s13, %s223_s21  ;;  %p229_p5 = scmp.lt.s32.totalorder %s223_s21, %s223_s21 }
   0xc   :  { %p230_p6 = por %p229_p5, %p228_p4 }
   0xe   :  { %p231_p7 = pnand %p230_p6, %p224_p3 }
  0x10   :  { %234 = shalt.err (!%p231_p7)
}
  0x11   :  { %s286_s22 = smov 128   ;;  %s287_s23 = smov 8  }
  0x12   :  { %22 = dma.hbm_to_vmem [thread:$0]  %s365_s0, 256, %s17_s13, [#allocation4], %s286_s22, %s286_s22, %s287_s23  }
  0x13   :  { %s288_s26 = smov [#allocation6]   ;;  %s235_s30 = scalar_lea.hbm %s366_s1, 512 }
  0x14   :  { %s28_s27 = sshll.u32 %s288_s26, 4  ;;  %p236_p8 = scmp.ne.s32.totalorder %s366_s1, %s235_s30  ;;  %s29_s27 = int_to_ptr.vmem [resolvable:$true] %s28_s27 }
  0x15   :  { %p239_p9 = scmp.lt.u32.totalorder %s235_s30, %s366_s1 }
  0x17   :  { %p241_p10 = pnand %p239_p9, %p236_p8 }
  0x19   :  { %244 = shalt.err (!%p241_p10)
}
  0x1a   :  { %s245_s8 = scalar_lea.vmem %s29_s27, 512  ;;  %p250_p12 = scmp.lt.s32.totalorder %s29_s27, %s29_s27 }
  0x1b   :  { %p246_p11 = scmp.ne.s32.totalorder %s29_s27, %s245_s8  ;;  %p251_p13 = scmp.lt.s32.totalorder %s245_s8, %s245_s8 }
  0x1d   :  { %p252_p0 = por %p251_p13, %p250_p12 }
  0x1f   :  { %p253_p1 = pnand %p252_p0, %p246_p11 }
  0x21   :  { %256 = shalt.err (!%p253_p1)
}
  0x22   :  { %34 = dma.hbm_to_vmem [thread:$0]  %s366_s1, 512, %s29_s27, [#allocation7], %s286_s22, %s286_s22, %s287_s23  }
  0x23   :  { %279 = dma.done.wait [#allocation4], 256  }
  0x24   :  { %280 = vsyncadd [#allocation4], 4294967040 }
  0x25   :  { %281 = dma.done.wait [#allocation7], 512  }
  0x26   :  { %282 = vsyncadd [#allocation7], 4294966784  ;;  %vm47_vm0 = vcmask 785408   ;;  %v289_v0 = vmov 0.0   ;;  %vm58_vm1 = vcmask 261120   ;;  %v54_v1 = vld [vmem:[#allocation6] sm:$0xff] }
  0x27   :  { %49 = vst.msk [vmem:[#allocation2 + $0x8] sm:$0xff] %vm47_vm0, %v289_v0  ;;  %48 = vst.msk [vmem:[#allocation2] sm:$0xff] %vm47_vm0, %v289_v0  ;;  %v55_v2 = vld [vmem:[#allocation6 + $0x8] sm:$0xff]  ;;  %v56_v3 = vld [vmem:[#allocation6 + $0x10] sm:$0xff]  ;;  %s290_s11 = smov [#allocation8]  }
  0x28   :  { %v199_v4 = vpack.c.bf16 %v55_v2, %v54_v1  ;;  %v57_v5 = vld [vmem:[#allocation6 + $0x18] sm:$0xff]  ;;  %v52_v6 = vld [vmem:[#allocation3] sm:$0xff]  ;;  %v181_v15 = vld [vmem:[%s367_s2] ss:$0 sm:$0xff]  ;;  %s166_s12 = sshll.u32 %s290_s11, 4  ;;  %s167_s12 = int_to_ptr.vmem [resolvable:$true] %s166_s12 }
  0x29   :  { %v203_v7 = vpack.c.bf16 %v57_v5, %v56_v3  ;;  %196 = vmatprep.mubr.msk.f32.mxu0 %vm58_vm1, %v52_v6  ;;  %v53_v8 = vld [vmem:[#allocation3 + $0x8] sm:$0xff]  ;;  %s257_s13 = scalar_lea.vmem %s167_s12, 256  ;;  %p262_p3 = scmp.lt.s32.totalorder %s167_s12, %s167_s12 }
  0x2a   :  { %200 = vmatprep.subr.bf16.mxu0 %v199_v4  ;;  %p258_p2 = scmp.ne.s32.totalorder %s167_s12, %s257_s13  ;;  %p263_p4 = scmp.lt.s32.totalorder %s257_s13, %s257_s13 }
  0x2b   :  { %202 = vmatpush3.bf16.msra.mxu0 %v199_v4 }
  0x2c   :  { %204 = vmatprep.subr.bf16.mxu0 %v203_v7  ;;  %p264_p5 = por %p263_p4, %p262_p3 }
  0x2e   :  { %v51_v9 = vld [vmem:[#allocation2 + $0x8] sm:$0xff]  ;;  %v50_v10 = vld [vmem:[#allocation2] sm:$0xff]  ;;  %p265_p6 = pnand %p264_p5, %p258_p2 }
  0x2f   :  { %206 = vmatpush3.bf16.msra.mxu0 %v203_v7 }
  0x32   :  { %197 = vmatmul.mubr.msk.f32.vlgmr.msra.gmra.mrb[0].mxu0 %vm58_vm1, %v53_v8 }
 0x105   :  { %v198_v11 = vpop.f32.mrb[0].mxu0 }
 0x106   :  { %v141_v12 = vadd.f32 %v198_v11, %v51_v9  ;;  %v131_v13 = vpop.f32.mrb[1].mxu0 }
 0x107   :  { %v140_v14 = vadd.f32 %v131_v13, %v50_v10 }
 0x108   :  { %144 = vst.msk [vmem:[#allocation2 + $0x8] sm:$0xff] %vm47_vm0, %v141_v12 }
 0x109   :  { %143 = vst.msk [vmem:[#allocation2] sm:$0xff] %vm47_vm0, %v140_v14 }
 0x10f   :  { %v149_v16 = vld [vmem:[#allocation2 + $0x8] sm:$0xff] }
 0x110   :  { %v148_v17 = vld [vmem:[#allocation2] sm:$0xff]  ;;  %v158_v18 = vadd.f32 %v181_v15, %v149_v16 }
 0x111   :  { %v157_v19 = vadd.f32 %v181_v15, %v148_v17 }
 0x112   :  { %160 = vst.msk [vmem:[#allocation8 + $0x8] sm:$0xff] %vm47_vm0, %v158_v18 }
 0x113   :  { %159 = vst.msk [vmem:[#allocation8] sm:$0xff] %vm47_vm0, %v157_v19 }
 0x114   :  { %268 = shalt.err (!%p265_p6)
}
 0x115   :  { %s269_s15 = scalar_lea.hbm %s368_s3, 256 }
 0x116   :  { %p270_p7 = scmp.ne.s32.totalorder %s368_s3, %s269_s15  ;;  %p273_p8 = scmp.lt.u32.totalorder %s269_s15, %s368_s3 }
 0x118   :  { %p275_p9 = pnand %p273_p8, %p270_p7 }
 0x11a   :  { %278 = shalt.err (!%p275_p9)
}
 0x11b   :  { %172 = dma.vmem_to_hbm [thread:$0]  %s167_s12, 256, %s368_s3, [#allocation5], %s286_s22, %s286_s22, %s287_s23  }
 0x11c   :  { %283 = dma.done.wait [#allocation5], 256  }
 0x11d   :  { %284 = vsyncadd [#allocation5], 4294967040 }
 0x11e   :  { %176 = vsyncpa [#allocation4], 1 }
 0x11f   :  { %177 = vsyncpa [#allocation7], 1 }
 0x120   :  { %178 = vsyncpa [#allocation5], 1 }

</bundles_post_ra>
